<compile_context>
chip_gen: v7x
topology: tpu7x:2x2x1
jax: 0.10.0
libtpu: 0.0.40
codegen_flags: <defaults>
</compile_context>

<pallas_src>
import functools
import math

import jax
import jax.numpy as jnp
from jax.experimental import pallas as pl
from jax.experimental.pallas import tpu as pltpu

_LANE = 128
_MIB = 1024 * 1024


def _sublane_for(dtype) -> int:
    """Native sublane packing: f32 -> 8, bf16/f16 -> 16, int8/fp8 -> 32."""
    return {4: 8, 2: 16, 1: 32}.get(jnp.dtype(dtype).itemsize, 8)


def _round_up(x: int, m: int) -> int:
    return ((x + m - 1) // m) * m


def _vmem_capacity_bytes() -> int:
    """Physical VMEM of the current chip; conservative (v7x-sized) fallback."""
    try:
        return int(pltpu.get_tpu_info().vmem_capacity_bytes)
    except Exception:
        return 64 * _MIB


def _mse_partial_kernel(x_ref, t_ref, o_ref, *, rows_total, row_tile, masked):
    """Write this row-block's partial sum of (x - t)^2 into o_ref (shape (1,1))."""
    d = x_ref[...].astype(jnp.float32) - t_ref[...].astype(jnp.float32)
    sq = d * d
    if masked:
        # Ragged last block: rows at/past `rows_total` hold undefined data.
        # jnp.where is a select, so even NaN garbage is dropped cleanly.
        valid = rows_total - pl.program_id(0) * row_tile
        row_ids = jax.lax.broadcasted_iota(jnp.int32, sq.shape, 0)
        sq = jnp.where(row_ids < valid, sq, 0.0)
    # Bulk of the reduce is vreg-wise VPU adds; the final cross-lane fold is a
    # per-block constant, fully hidden under the ~MiB-scale input DMA.
    o_ref[...] = jnp.sum(sq, keepdims=True)


def content_loss_forward(inp, target):
    """Pallas equivalent of ContentLoss.forward.

    Returns (input_unchanged, loss) with loss = mean((input - target)**2),
    matching F.mse_loss with the default 'mean' reduction.
    """
    assert inp.shape == target.shape, "input/target shape mismatch"
    n = math.prod(inp.shape) if inp.shape else 1
    itemsize = jnp.dtype(inp.dtype).itemsize
    sublane = _sublane_for(inp.dtype)

    # Generation-aware budgets: v7x has 64 MiB VMEM/TC, v5e/v6e have 128 MiB.
    if _vmem_capacity_bytes() > 64 * _MIB:          # v5e / v6e
        block_budget = 6 * _MIB
        vmem_limit = 48 * _MIB
    else:                                           # v7x (or unknown: be safe)
        block_budget = 3 * _MIB
        vmem_limit = 32 * _MIB

    # ---- Lane-dense 2-D view: (rows, cols) with cols a multiple of 128 ----
    cols = None
    for c in (1024, 512, 256, 128):                 # prefer rows >= sublane
        if n % c == 0 and n // c >= sublane:
            cols = c
            break
    if cols is None:
        for c in (1024, 512, 256, 128):
            if n % c == 0:
                cols = c
                break

    x_flat = inp.reshape(-1)
    t_flat = target.reshape(-1)
    if cols is None:
        # Awkward element count: zero-pad BOTH operands identically to a
        # 128-multiple; the padded region contributes (0 - 0)^2 = 0.
        cols = _LANE
        padded = _round_up(n, cols)
        x_flat = jnp.pad(x_flat, (0, padded - n))
        t_flat = jnp.pad(t_flat, (0, padded - n))

    rows = x_flat.shape[0] // cols
    x2d = x_flat.reshape(rows, cols)
    t2d = t_flat.reshape(rows, cols)

    # ---- Row tile from the byte budget, aligned to the native sublane ----
    budget_rows = max(sublane, (block_budget // (cols * itemsize)) // sublane * sublane)
    if rows <= budget_rows:
        row_tile = rows                  # block == full dim -> always legal
    else:
        row_tile = budget_rows           # multiple of the native sublane
    num_blocks = (rows + row_tile - 1) // row_tile
    needs_mask = (rows % row_tile) != 0  # only compile the mask when ragged

    kernel = functools.partial(
        _mse_partial_kernel, rows_total=rows, row_tile=row_tile, masked=needs_mask
    )

    partials = pl.pallas_call(
        kernel,
        out_shape=jax.ShapeDtypeStruct((num_blocks, 1), jnp.float32),
        grid_spec=pltpu.PrefetchScalarGridSpec(
            num_scalar_prefetch=0,
            grid=(num_blocks,),
            in_specs=[
                pl.BlockSpec((row_tile, cols), lambda i: (i, 0)),
                pl.BlockSpec((row_tile, cols), lambda i: (i, 0)),
            ],
            # One partial per row-block, written exactly once -> no reduction
            # axis, fully parallel grid (both v7x TensorCores participate).
            out_specs=pl.BlockSpec((1, 1), lambda i: (i, 0)),
        ),
        compiler_params=pltpu.CompilerParams(
            dimension_semantics=("parallel",),
            vmem_limit_bytes=vmem_limit,
        ),
        cost_estimate=pl.CostEstimate(
            flops=3 * n,
            transcendentals=0,
            bytes_accessed=2 * n * itemsize + num_blocks * 4,
        ),
    )(x2d, t2d)

    # Tiny pairwise sum of the per-block partials + one scalar multiply by the
    # precomputed reciprocal of the true (unpadded) element count.
    loss = jnp.sum(partials) * jnp.float32(1.0 / n)

    # ContentLoss.forward returns its input unchanged.
    return inp, loss


if __name__ == "__main__":
    key = jax.random.PRNGKey(0)
    k_img, k_tgt = jax.random.split(key)
    N, C, H, W = 2, 4, 16, 16

    img = jax.random.uniform(k_img, (N, C, H, W), dtype=jnp.float32)
    target = jax.random.uniform(k_tgt, (N, C, H, W), dtype=jnp.float32)

    out, loss = content_loss_forward(img, target)
    out = jax.block_until_ready(out)
    loss = jax.block_until_ready(loss)

    # Reference in plain JAX (same semantics as the torch module).
    ref_loss = jnp.mean((img - target) ** 2)
    assert out.shape == img.shape
    assert jnp.allclose(out, img)                    # forward returns input unchanged
    assert jnp.allclose(loss, ref_loss, atol=1e-6, rtol=1e-6)

    print("KERNEL_OK")
</pallas_src>

<mosaic_0001>
module attributes {stable_mosaic.version = 11 : i64} {
  func.func @_mse_partial_kernel(%arg0: i32, %arg1: memref<8x256xf32, #tpu.memory_space<vmem>>, %arg2: memref<8x256xf32, #tpu.memory_space<vmem>>, %arg3: memref<1x1xf32, #tpu.memory_space<vmem>>) attributes {dimension_semantics = [#tpu.dimension_semantics<parallel>], iteration_bounds = array<i64: 1>, scalar_prefetch = 0 : i64, scratch_operands = 0 : i64, tpu.core_type = #tpu.core_type<tc>, window_params = [{transform_indices = @transform_0, window_bounds = array<i64: 8, 256>}, {transform_indices = @transform_1, window_bounds = array<i64: 8, 256>}, {transform_indices = @transform_2, window_bounds = array<i64: 1, 1>}]} {
    %c0 = arith.constant 0 : index
    %c0_0 = arith.constant 0 : index
    %0 = vector.load %arg1[%c0, %c0_0] : memref<8x256xf32, #tpu.memory_space<vmem>>, vector<8x256xf32>
    %c0_1 = arith.constant 0 : index
    %c0_2 = arith.constant 0 : index
    %1 = vector.load %arg2[%c0_1, %c0_2] : memref<8x256xf32, #tpu.memory_space<vmem>>, vector<8x256xf32>
    %2 = arith.subf %0, %1 : vector<8x256xf32>
    %3 = arith.mulf %2, %2 : vector<8x256xf32>
    %4 = vector.shape_cast %3 : vector<8x256xf32> to vector<1x8x256xf32>
    %cst = arith.constant dense<0.000000e+00> : vector<1xf32>
    %5 = vector.multi_reduction <add>, %4, %cst [1, 2] : vector<1x8x256xf32> to vector<1xf32>
    %6 = vector.shape_cast %5 : vector<1xf32> to vector<1x1x1xf32>
    %7 = vector.extract %6[0, 0, 0] : f32 from vector<1x1x1xf32>
    %8 = vector.broadcast %7 : f32 to vector<1x1xf32>
    %c0_3 = arith.constant 0 : index
    %c0_4 = arith.constant 0 : index
    %9 = vector.load %arg3[%c0_3, %c0_4] : memref<1x1xf32, #tpu.memory_space<vmem>>, vector<1x1xf32>
    tpu.vector_store %arg3[%c0_3, %c0_4], %8 {strides = array<i32>} : memref<1x1xf32, #tpu.memory_space<vmem>>, vector<1x1xf32>,
    return
  }
  func.func @transform_0(%arg0: i32) -> (i32, i32) {
    %c0_i32 = arith.constant 0 : i32
    %c0_i32_0 = arith.constant 0 : i32
    return %arg0, %c0_i32 : i32, i32
  }
  func.func @transform_1(%arg0: i32) -> (i32, i32) {
    %c0_i32 = arith.constant 0 : i32
    %c0_i32_0 = arith.constant 0 : i32
    return %arg0, %c0_i32 : i32, i32
  }
  func.func @transform_2(%arg0: i32) -> (i32, i32) {
    %c0_i32 = arith.constant 0 : i32
    %c0_i32_0 = arith.constant 0 : i32
    return %arg0, %c0_i32 : i32, i32
  }
}

</mosaic_0001>

<bundles_post_ra>
// kernel: tpu_custom_call.1
= control target key start
LH: loop header
LB: loop body
LE: loop exit
PB: predicated region body
PF: predicated region fallthrough
CT: control target
= control target key end

     0   :  { %7 = vsyncpa [#allocation3], 0  ;;  %s204_s0 = inlined_call_operand.hbm [shape: f32[8,256], index: 0, kind: input, shape index: {}]   ;;  %s205_s1 = inlined_call_operand.hbm [shape: f32[8,256], index: 1, kind: input, shape index: {}]   ;;  %s206_s2 = inlined_call_operand.hbm [shape: f32[1,1], index: 2, kind: output, shape index: {}]  }
   0x1   :  { %8 = vsyncpa [#allocation6], 0 }
   0x2   :  { %9 = vsyncpa [#allocation4], 0  ;;  %s150_s9 = smov [#allocation2]   ;;  %s151_s11 = smov [#allocation5]  }
   0x3   :  { %s16_s10 = sshll.u32 %s150_s9, 4  ;;  %s26_s12 = sshll.u32 %s151_s11, 4  ;;  %s17_s10 = int_to_ptr.vmem [resolvable:$true] %s16_s10  ;;  %s27_s12 = int_to_ptr.vmem [resolvable:$true] %s26_s12 }
   0x4   :  { %s78_s15 = scalar_lea.hbm %s204_s0, 256 }
   0x5   :  { %p79_p0 = scmp.ne.s32.totalorder %s204_s0, %s78_s15  ;;  %p82_p1 = scmp.lt.u32.totalorder %s78_s15, %s204_s0 }
   0x7   :  { %p84_p2 = pnand %p82_p1, %p79_p0 }
   0x9   :  { %87 = shalt.err (!%p84_p2)
}
   0xa   :  { %s88_s20 = scalar_lea.vmem %s17_s10, 256  ;;  %p93_p4 = scmp.lt.s32.totalorder %s17_s10, %s17_s10 }
   0xb   :  { %p89_p3 = scmp.ne.s32.totalorder %s17_s10, %s88_s20  ;;  %p94_p5 = scmp.lt.s32.totalorder %s88_s20, %s88_s20 }
   0xd   :  { %p95_p6 = por %p94_p5, %p93_p4 }
   0xf   :  { %p96_p7 = pnand %p95_p6, %p89_p3 }
  0x11   :  { %99 = shalt.err (!%p96_p7)
}
  0x12   :  { %19 = dma.hbm_to_vmem [thread:$0]  %s204_s0, 256, %s17_s10, [#allocation3]  }
  0x13   :  { %s100_s25 = scalar_lea.hbm %s205_s1, 256 }
  0x14   :  { %p101_p8 = scmp.ne.s32.totalorder %s205_s1, %s100_s25  ;;  %p104_p9 = scmp.lt.u32.totalorder %s100_s25, %s205_s1 }
  0x16   :  { %p106_p10 = pnand %p104_p9, %p101_p8 }
  0x18   :  { %109 = shalt.err (!%p106_p10)
}
  0x19   :  { %s110_s30 = scalar_lea.vmem %s27_s12, 256  ;;  %p115_p12 = scmp.lt.s32.totalorder %s27_s12, %s27_s12 }
  0x1a   :  { %p111_p11 = scmp.ne.s32.totalorder %s27_s12, %s110_s30  ;;  %p116_p13 = scmp.lt.s32.totalorder %s110_s30, %s110_s30 }
  0x1c   :  { %p117_p0 = por %p116_p13, %p115_p12 }
  0x1e   :  { %p118_p1 = pnand %p117_p0, %p111_p11 }
  0x20   :  { %121 = shalt.err (!%p118_p1)
}
  0x21   :  { %29 = dma.hbm_to_vmem [thread:$0]  %s205_s1, 256, %s27_s12, [#allocation6]  }
  0x22   :  { %144 = dma.done.wait [#allocation3], 256  }
  0x23   :  { %145 = vsyncadd [#allocation3], 4294967040 }
  0x24   :  { %146 = dma.done.wait [#allocation6], 256  }
  0x25   :  { %147 = vsyncadd [#allocation6], 4294967040  ;;  %v36_v0 = vld [vmem:[#allocation2] sm:$0xff]  ;;  %v37_v1 = vld [vmem:[#allocation2 + $0x8] sm:$0xff]  ;;  %s152_s1 = smov [#allocation7]   ;;  %vm55_vm0 = vcmask 0  }
  0x26   :  { %v38_v2 = vld [vmem:[#allocation5] sm:$0xff]  ;;  %v39_v3 = vld [vmem:[#allocation5 + $0x8] sm:$0xff]  ;;  %s63_s4 = sshll.u32 %s152_s1, 4  ;;  %s64_s4 = int_to_ptr.vmem [resolvable:$true] %s63_s4 }
  0x27   :  { %v40_v4 = vsub.f32 %v36_v0, %v38_v2  ;;  %v41_v5 = vsub.f32 %v37_v1, %v39_v3  ;;  %s122_s6 = scalar_lea.vmem %s64_s4, 16  ;;  %s126_s7 = scalar_lea.vmem %s64_s4, 32 }
  0x28   :  { %p123_p2 = scmp.ne.s32.totalorder %s64_s4, %s122_s6  ;;  %p127_p3 = scmp.lt.s32.totalorder %s64_s4, %s64_s4 }
  0x29   :  { %v42_v6 = vmul.f32 %v40_v4, %v40_v4  ;;  %v43_v7 = vmul.f32 %v41_v5, %v41_v5  ;;  %p128_p4 = scmp.lt.s32.totalorder %s126_s7, %s122_s6 }
  0x2b   :  { %v44_v8 = vadd.f32 %v43_v7, %v42_v6  ;;  %p129_p5 = por %p128_p4, %p127_p3 }
  0x2d   :  { %45 = vadd.xlane.f32.xlu0 %v44_v8  ;;  %p130_p6 = pnand %p129_p5, %p123_p2 }
  0xba   :  { %v46_v9 = vpop.xlane.xlu0 %45 }
  0xbb   :  { %v47_v10 = vrot.slane %v46_v9, 4 }
  0xbd   :  { %v48_v11 = vadd.f32 %v47_v10, %v46_v9 }
  0xbf   :  { %v49_v12 = vrot.slane %v48_v11, 2 }
  0xc1   :  { %v50_v13 = vadd.f32 %v49_v12, %v48_v11 }
  0xc3   :  { %v51_v14 = vrot.slane %v50_v13, 1 }
  0xc5   :  { %v52_v15 = vadd.f32 %v51_v14, %v50_v13 }
  0xc7   :  { %73 = vpush %v52_v15 }
  0xf8   :  { %s74_s5 = spop %73 }
  0xf9   :  { %v54_v16 = vstv %s74_s5 }
  0xfa   :  { %56 = vst.msk [vmem:[#allocation7] sm:$0x1] %vm55_vm0, %v54_v16 }
  0xfb   :  { %133 = shalt.err (!%p130_p6)
}
  0xfc   :  { %s134_s10 = scalar_lea.hbm %s206_s2, 16 }
  0xfd   :  { %p135_p7 = scmp.ne.s32.totalorder %s206_s2, %s134_s10  ;;  %p138_p8 = scmp.lt.u32.totalorder %s134_s10, %s206_s2 }
  0xff   :  { %p140_p9 = pnand %p138_p8, %p135_p7 }
 0x101   :  { %143 = shalt.err (!%p140_p9)
}
 0x102   :  { %66 = dma.vmem_to_hbm [thread:$0]  %s64_s4, 16, %s206_s2, [#allocation4]  }
 0x103   :  { %148 = dma.done.wait [#allocation4], 16  }
 0x104   :  { %149 = vsyncadd [#allocation4], 4294967280 }
 0x105   :  { %70 = vsyncpa [#allocation3], 1 }
 0x106   :  { %71 = vsyncpa [#allocation6], 1 }
 0x107   :  { %72 = vsyncpa [#allocation4], 1 }

</bundles_post_ra>
